<compile_context>
chip_gen: v5e
topology: v5e:2x2
jax: 0.10.0
libtpu: 0.0.40
codegen_flags: <defaults>
</compile_context>

<pallas_src>
import functools

import jax
import jax.numpy as jnp
from jax.experimental import pallas as pl
from jax.experimental.pallas import tpu as pltpu

_EPS = 1e-5


def _conv_stats_kernel(x_ref, w_ref, y_ref, ssq_ref, *, H, W, B):
    """Phase 1 (B images per grid step):
       3x3 conv as 3 shifted-row-slice matmuls (K = 3*C_in) + per-channel BN partials.

       x_ref:   (B, (H+2)*W, 3*C_in) bf16 kw-packed, H-zero-padded image rows
       w_ref:   (3, 3*C_in, C_out)   bf16 one (3*C_in, C_out) slab per kh tap
       y_ref:   (B, H*W, C_out)      bf16 conv output (already de-padded)
       ssq_ref: (1, 2, C_out)        f32 [sum, sum_of_squares] over this step's pixels
    """
    HW = H * W
    c_out = y_ref.shape[-1]

    # Hoist the (small) weight slabs out of the per-image loop.
    w0 = w_ref[0]
    w1 = w_ref[1]
    w2 = w_ref[2]

    s = jnp.zeros((1, c_out), jnp.float32)
    q = jnp.zeros((1, c_out), jnp.float32)
    for b in range(B):  # static unroll; B is small
        # Tap kh is a contiguous, sublane-aligned row slice of the kw-packed image.
        acc = jnp.dot(x_ref[b, 0:HW, :], w0, preferred_element_type=jnp.float32)
        acc = acc + jnp.dot(x_ref[b, W:W + HW, :], w1,
                            preferred_element_type=jnp.float32)
        acc = acc + jnp.dot(x_ref[b, 2 * W:2 * W + HW, :], w2,
                            preferred_element_type=jnp.float32)
        y_ref[b] = acc.astype(y_ref.dtype)
        # BN partials over this image's pixels (no masking needed: no junk columns).
        s = s + jnp.sum(acc, axis=0, keepdims=True)
        q = q + jnp.sum(acc * acc, axis=0, keepdims=True)
    ssq_ref[0] = jnp.concatenate([s, q], axis=0)          # (2, C_out)


def _bn_relu_kernel(y_ref, scale_ref, shift_ref, o_ref):
    """Phase 2: fused per-channel affine (precomputed scale/shift) + ReLU."""
    o_ref[...] = jnp.maximum(
        y_ref[...].astype(jnp.float32) * scale_ref[...] + shift_ref[...], 0.0)


def _pick_images_per_step(N, rows_in, rows_out, c_in, c_out):
    """Largest divisor B of N whose double-buffered blocks fit a ~12 MiB budget while
       keeping >= 2 grid steps (so v7x's two TensorCores both get work)."""
    budget = 12 * 1024 * 1024
    best = 1
    for cand in range(1, N + 1):
        if N % cand:
            continue
        if N >= 2 and N // cand < 2:
            continue
        per_step = (2 * cand * rows_in * 3 * c_in * 2      # x block, 2x buffered bf16
                    + 2 * cand * rows_out * c_out * 2      # y block, 2x buffered bf16
                    + 2 * cand * rows_out * c_out * 4      # phase-2 f32 out block
                    + cand * rows_out * c_out * 4)         # live f32 accumulator
        if per_step <= budget:
            best = cand
    return best


@jax.jit
def conv_bn_forward(x_nchw, w_conv, gamma, beta):
    """x_nchw: (N, C_in, H, W) f32; w_conv: (C_out, C_in, 3, 3) f32 (PyTorch layout)."""
    N, C_in, H, W = x_nchw.shape
    C_out = w_conv.shape[0]
    HW = H * W
    rows_in = (H + 2) * W

    # ---- glue: NCHW -> NHWC bf16, zero-pad, pack the 3 kw taps into the lane dim.
    # x_kw[n, h, w, kw*C_in + c] = x_pad[n, h, w + kw, c]   (h over padded rows, w valid)
    x_nhwc = jnp.transpose(x_nchw, (0, 2, 3, 1)).astype(jnp.bfloat16)
    x_pad = jnp.pad(x_nhwc, ((0, 0), (1, 1), (1, 1), (0, 0)))
    x_kw = jnp.concatenate([x_pad[:, :, kw:kw + W, :] for kw in range(3)], axis=-1)
    x_flat = x_kw.reshape(N, rows_in, 3 * C_in)

    # weights: (C_out, C_in, 3, 3) -> (3, 3*C_in, C_out): w_taps[kh, kw*C_in + c, o]
    w_taps = jnp.transpose(w_conv, (2, 3, 1, 0)).reshape(3, 3 * C_in, C_out)
    w_taps = w_taps.astype(jnp.bfloat16)

    B = _pick_images_per_step(N, rows_in, HW, C_in, C_out)
    G = N // B

    # VMEM budget: actual double-buffered block bytes + headroom, capped for v7x (64 MiB).
    x_blk = B * rows_in * 3 * C_in * 2
    y_blk = B * HW * C_out * 2
    o_blk = B * HW * C_out * 4
    w_blk = 3 * 3 * C_in * C_out * 2
    need = 2 * (x_blk + y_blk + o_blk + w_blk) + B * HW * C_out * 4
    vmem_limit = int(min(40 * 1024 * 1024, max(32 * 1024 * 1024, 2 * need)))
    cparams = pltpu.CompilerParams(
        dimension_semantics=("parallel",),      # batch axis -> both TensorCores on v7x
        vmem_limit_bytes=vmem_limit)

    # ---- phase 1: conv (bf16 in / f32 acc / bf16 out) + per-step per-channel (sum, sumsq)
    kernel1 = functools.partial(_conv_stats_kernel, H=H, W=W, B=B)
    y, ssq = pl.pallas_call(
        kernel1,
        out_shape=(jax.ShapeDtypeStruct((N, HW, C_out), jnp.bfloat16),
                   jax.ShapeDtypeStruct((G, 2, C_out), jnp.float32)),
        grid=(G,),
        in_specs=[
            pl.BlockSpec((B, rows_in, 3 * C_in), lambda g: (g, 0, 0)),
            pl.BlockSpec((3, 3 * C_in, C_out), lambda g: (0, 0, 0)),
        ],
        out_specs=(
            pl.BlockSpec((B, HW, C_out), lambda g: (g, 0, 0)),
            pl.BlockSpec((1, 2, C_out), lambda g: (g, 0, 0)),
        ),
        compiler_params=cparams,
    )(x_flat, w_taps)

    # ---- tiny cross-step combine + per-channel scale/shift (a few KB of XLA glue)
    m_valid = jnp.float32(N * HW)
    tot = jnp.sum(ssq, axis=0)                               # (2, C_out)
    mean = tot[0] / m_valid
    var = jnp.maximum(tot[1] / m_valid - mean * mean, 0.0)
    inv = jax.lax.rsqrt(var + _EPS)
    gamma32 = gamma.astype(jnp.float32)
    beta32 = beta.astype(jnp.float32)
    scale = (gamma32 * inv).reshape(1, C_out)
    shift = (beta32 - mean * gamma32 * inv).reshape(1, C_out)

    # ---- phase 2: fused affine + ReLU, bf16 read -> final f32 write, no padding anywhere
    out_flat = pl.pallas_call(
        _bn_relu_kernel,
        out_shape=jax.ShapeDtypeStruct((N, HW, C_out), jnp.float32),
        grid=(G,),
        in_specs=[
            pl.BlockSpec((B, HW, C_out), lambda g: (g, 0, 0)),
            pl.BlockSpec((1, C_out), lambda g: (0, 0)),
            pl.BlockSpec((1, C_out), lambda g: (0, 0)),
        ],
        out_specs=pl.BlockSpec((B, HW, C_out), lambda g: (g, 0, 0)),
        compiler_params=cparams,
    )(y, scale, shift)

    # Free reshape + the NHWC->NCHW transpose required by the PyTorch output layout.
    out = out_flat.reshape(N, H, W, C_out)
    return jnp.transpose(out, (0, 3, 1, 2))


def reference_forward(x_nchw, w_conv, gamma, beta):
    """Pure-JAX reference matching the kernel's bf16-input / f32-accumulate MXU numerics:
       conv2d(pad=1, stride=1, no bias) -> BatchNorm(batch stats, eps=1e-5) -> ReLU, NCHW."""
    y = jax.lax.conv_general_dilated(
        x_nchw.astype(jnp.bfloat16), w_conv.astype(jnp.bfloat16),
        window_strides=(1, 1), padding=((1, 1), (1, 1)),
        dimension_numbers=("NCHW", "OIHW", "NCHW"),
        preferred_element_type=jnp.float32)
    mean = jnp.mean(y, axis=(0, 2, 3), keepdims=True)
    var = jnp.mean((y - mean) ** 2, axis=(0, 2, 3), keepdims=True)
    yn = (y - mean) * jax.lax.rsqrt(var + _EPS)
    yn = yn * gamma.reshape(1, -1, 1, 1) + beta.reshape(1, -1, 1, 1)
    return jnp.maximum(yn, 0.0)


if __name__ == "__main__":
    # small shapes consistent with the module: N=2, C_in=4, C_out=8, 16x16 spatial
    N, C_in, C_out, H, W = 2, 4, 8, 16, 16
    key = jax.random.PRNGKey(0)
    kx, kw = jax.random.split(key)

    x = jax.random.normal(kx, (N, C_in, H, W), dtype=jnp.float32)
    # deterministic Conv2d weight init (kaiming-style scale), no bias
    w_conv = jax.random.normal(kw, (C_out, C_in, 3, 3), dtype=jnp.float32) / jnp.sqrt(9.0 * C_in)
    # BatchNorm2d: weight filled with bn_weight_init=1.0, bias zeros
    gamma = jnp.ones((C_out,), dtype=jnp.float32)
    beta = jnp.zeros((C_out,), dtype=jnp.float32)

    out = jax.block_until_ready(conv_bn_forward(x, w_conv, gamma, beta))
    ref = jax.block_until_ready(reference_forward(x, w_conv, gamma, beta))

    assert out.shape == (N, C_out, H, W)
    max_err = float(jnp.max(jnp.abs(out - ref)))
    # bf16 conv intermediate (per perf review) adds ~2^-9 relative rounding vs the f32 ref
    assert jnp.allclose(out, ref, rtol=5e-3, atol=5e-3), max_err

    print("KERNEL_OK")
</pallas_src>

<mosaic_0001>
module attributes {stable_mosaic.version = 11 : i64} {
  func.func @_conv_stats_kernel(%arg0: i32, %arg1: memref<1x288x12xbf16, #tpu.memory_space<vmem>>, %arg2: memref<3x12x8xbf16, #tpu.memory_space<vmem>>, %arg3: memref<1x256x8xbf16, #tpu.memory_space<vmem>>, %arg4: memref<1x2x8xf32, #tpu.memory_space<vmem>>) attributes {dimension_semantics = [#tpu.dimension_semantics<parallel>], iteration_bounds = array<i64: 2>, scalar_prefetch = 0 : i64, scratch_operands = 0 : i64, tpu.core_type = #tpu.core_type<tc>, window_params = [{transform_indices = @transform_0, window_bounds = array<i64: 1, 288, 12>}, {pipeline_mode = #tpu.pipeline_mode<synchronous>, transform_indices = @transform_1, window_bounds = array<i64: 3, 12, 8>}, {transform_indices = @transform_2, window_bounds = array<i64: 1, 256, 8>}, {transform_indices = @transform_3, window_bounds = array<i64: 1, 2, 8>}]} {
    %c0 = arith.constant 0 : index
    %c0_0 = arith.constant 0 : index
    %c0_1 = arith.constant 0 : index
    %0 = vector.load %arg2[%c0, %c0_0, %c0_1] : memref<3x12x8xbf16, #tpu.memory_space<vmem>>, vector<1x12x8xbf16>
    %1 = vector.shape_cast %0 : vector<1x12x8xbf16> to vector<12x8xbf16>
    %c1 = arith.constant 1 : index
    %c0_2 = arith.constant 0 : index
    %c0_3 = arith.constant 0 : index
    %2 = vector.load %arg2[%c1, %c0_2, %c0_3] : memref<3x12x8xbf16, #tpu.memory_space<vmem>>, vector<1x12x8xbf16>
    %3 = vector.shape_cast %2 : vector<1x12x8xbf16> to vector<12x8xbf16>
    %c2 = arith.constant 2 : index
    %c0_4 = arith.constant 0 : index
    %c0_5 = arith.constant 0 : index
    %4 = vector.load %arg2[%c2, %c0_4, %c0_5] : memref<3x12x8xbf16, #tpu.memory_space<vmem>>, vector<1x12x8xbf16>
    %5 = vector.shape_cast %4 : vector<1x12x8xbf16> to vector<12x8xbf16>
    %cst = arith.constant 0.000000e+00 : f32
    %6 = vector.broadcast %cst : f32 to vector<1x8xf32>
    %cst_6 = arith.constant 0.000000e+00 : f32
    %7 = vector.broadcast %cst_6 : f32 to vector<1x8xf32>
    %c0_7 = arith.constant 0 : index
    %c0_8 = arith.constant 0 : index
    %c0_9 = arith.constant 0 : index
    %8 = vector.load %arg1[%c0_7, %c0_8, %c0_9] : memref<1x288x12xbf16, #tpu.memory_space<vmem>>, vector<1x256x12xbf16>
    %9 = vector.shape_cast %8 : vector<1x256x12xbf16> to vector<256x12xbf16>
    %cst_10 = arith.constant dense<0.000000e+00> : vector<256x8xf32>
    %10 = tpu.matmul %9, %1, %cst_10 {dimension_numbers = #tpu.dot_dimension_numbers<[1], [0], [0], [1], [0, 0, 1, 1], [], []>} : vector<256x12xbf16>, vector<12x8xbf16>, vector<256x8xf32> -> vector<256x8xf32>
    %c0_11 = arith.constant 0 : index
    %c16 = arith.constant 16 : index
    %c0_12 = arith.constant 0 : index
    %11 = vector.load %arg1[%c0_11, %c16, %c0_12] : memref<1x288x12xbf16, #tpu.memory_space<vmem>>, vector<1x256x12xbf16>
    %12 = vector.shape_cast %11 : vector<1x256x12xbf16> to vector<256x12xbf16>
    %cst_13 = arith.constant dense<0.000000e+00> : vector<256x8xf32>
    %13 = tpu.matmul %12, %3, %cst_13 {dimension_numbers = #tpu.dot_dimension_numbers<[1], [0], [0], [1], [0, 0, 1, 1], [], []>} : vector<256x12xbf16>, vector<12x8xbf16>, vector<256x8xf32> -> vector<256x8xf32>
    %14 = arith.addf %10, %13 : vector<256x8xf32>
    %c0_14 = arith.constant 0 : index
    %c32 = arith.constant 32 : index
    %c0_15 = arith.constant 0 : index
    %15 = vector.load %arg1[%c0_14, %c32, %c0_15] : memref<1x288x12xbf16, #tpu.memory_space<vmem>>, vector<1x256x12xbf16>
    %16 = vector.shape_cast %15 : vector<1x256x12xbf16> to vector<256x12xbf16>
    %cst_16 = arith.constant dense<0.000000e+00> : vector<256x8xf32>
    %17 = tpu.matmul %16, %5, %cst_16 {dimension_numbers = #tpu.dot_dimension_numbers<[1], [0], [0], [1], [0, 0, 1, 1], [], []>} : vector<256x12xbf16>, vector<12x8xbf16>, vector<256x8xf32> -> vector<256x8xf32>
    %18 = arith.addf %14, %17 : vector<256x8xf32>
    %19 = arith.truncf %18 : vector<256x8xf32> to vector<256x8xbf16>
    %c0_17 = arith.constant 0 : index
    %c0_18 = arith.constant 0 : index
    %c0_19 = arith.constant 0 : index
    %20 = vector.load %arg3[%c0_17, %c0_18, %c0_19] : memref<1x256x8xbf16, #tpu.memory_space<vmem>>, vector<1x256x8xbf16>
    %21 = vector.shape_cast %20 : vector<1x256x8xbf16> to vector<256x8xbf16>
    %22 = vector.shape_cast %19 : vector<256x8xbf16> to vector<1x256x8xbf16>
    tpu.vector_store %arg3[%c0_17, %c0_18, %c0_19], %22 {strides = array<i32>} : memref<1x256x8xbf16, #tpu.memory_space<vmem>>, vector<1x256x8xbf16>,
    %cst_20 = arith.constant dense<0.000000e+00> : vector<8xf32>
    %23 = vector.multi_reduction <add>, %18, %cst_20 [0] : vector<256x8xf32> to vector<8xf32>
    %24 = vector.shape_cast %23 : vector<8xf32> to vector<1x8xf32>
    %25 = arith.addf %6, %24 : vector<1x8xf32>
    %26 = arith.mulf %18, %18 : vector<256x8xf32>
    %cst_21 = arith.constant dense<0.000000e+00> : vector<8xf32>
    %27 = vector.multi_reduction <add>, %26, %cst_21 [0] : vector<256x8xf32> to vector<8xf32>
    %28 = vector.shape_cast %27 : vector<8xf32> to vector<1x8xf32>
    %29 = arith.addf %7, %28 : vector<1x8xf32>
    %30 = tpu.concatenate %25, %29 in 0 : vector<1x8xf32>, vector<1x8xf32> -> vector<2x8xf32>
    %c0_22 = arith.constant 0 : index
    %c0_23 = arith.constant 0 : index
    %c0_24 = arith.constant 0 : index
    %31 = vector.load %arg4[%c0_22, %c0_23, %c0_24] : memref<1x2x8xf32, #tpu.memory_space<vmem>>, vector<1x2x8xf32>
    %32 = vector.shape_cast %31 : vector<1x2x8xf32> to vector<2x8xf32>
    %33 = vector.shape_cast %30 : vector<2x8xf32> to vector<1x2x8xf32>
    tpu.vector_store %arg4[%c0_22, %c0_23, %c0_24], %33 {strides = array<i32>} : memref<1x2x8xf32, #tpu.memory_space<vmem>>, vector<1x2x8xf32>,
    return
  }
  func.func @transform_0(%arg0: i32) -> (i32, i32, i32) {
    %c0_i32 = arith.constant 0 : i32
    %c0_i32_0 = arith.constant 0 : i32
    %c0_i32_1 = arith.constant 0 : i32
    return %arg0, %c0_i32, %c0_i32_0 : i32, i32, i32
  }
  func.func @transform_1(%arg0: i32) -> (i32, i32, i32) {
    %c0_i32 = arith.constant 0 : i32
    %c0_i32_0 = arith.constant 0 : i32
    %c0_i32_1 = arith.constant 0 : i32
    %c0_i32_2 = arith.constant 0 : i32
    return %c0_i32, %c0_i32_0, %c0_i32_1 : i32, i32, i32
  }
  func.func @transform_2(%arg0: i32) -> (i32, i32, i32) {
    %c0_i32 = arith.constant 0 : i32
    %c0_i32_0 = arith.constant 0 : i32
    %c0_i32_1 = arith.constant 0 : i32
    return %arg0, %c0_i32, %c0_i32_0 : i32, i32, i32
  }
  func.func @transform_3(%arg0: i32) -> (i32, i32, i32) {
    %c0_i32 = arith.constant 0 : i32
    %c0_i32_0 = arith.constant 0 : i32
    %c0_i32_1 = arith.constant 0 : i32
    return %arg0, %c0_i32, %c0_i32_0 : i32, i32, i32
  }
}

module attributes {stable_mosaic.version = 11 : i64} {
  func.func @_bn_relu_kernel(%arg0: i32, %arg1: memref<1x256x8xbf16, #tpu.memory_space<vmem>>, %arg2: memref<1x8xf32, #tpu.memory_space<vmem>>, %arg3: memref<1x8xf32, #tpu.memory_space<vmem>>, %arg4: memref<1x256x8xf32, #tpu.memory_space<vmem>>) attributes {dimension_semantics = [#tpu.dimension_semantics<parallel>], iteration_bounds = array<i64: 2>, scalar_prefetch = 0 : i64, scratch_operands = 0 : i64, tpu.core_type = #tpu.core_type<tc>, window_params = [{transform_indices = @transform_0, window_bounds = array<i64: 1, 256, 8>}, {pipeline_mode = #tpu.pipeline_mode<synchronous>, transform_indices = @transform_1, window_bounds = array<i64: 1, 8>}, {pipeline_mode = #tpu.pipeline_mode<synchronous>, transform_indices = @transform_2, window_bounds = array<i64: 1, 8>}, {transform_indices = @transform_3, window_bounds = array<i64: 1, 256, 8>}]} {
    %c0 = arith.constant 0 : index
    %c0_0 = arith.constant 0 : index
    %c0_1 = arith.constant 0 : index
    %0 = vector.load %arg1[%c0, %c0_0, %c0_1] : memref<1x256x8xbf16, #tpu.memory_space<vmem>>, vector<1x256x8xbf16>
    %1 = arith.extf %0 : vector<1x256x8xbf16> to vector<1x256x8xf32>
    %c0_2 = arith.constant 0 : index
    %c0_3 = arith.constant 0 : index
    %2 = vector.load %arg2[%c0_2, %c0_3] : memref<1x8xf32, #tpu.memory_space<vmem>>, vector<1x8xf32>
    %3 = vector.shape_cast %2 : vector<1x8xf32> to vector<1x1x8xf32>
    %4 = vector.broadcast %3 : vector<1x1x8xf32> to vector<1x256x8xf32>
    %5 = arith.mulf %1, %4 : vector<1x256x8xf32>
    %c0_4 = arith.constant 0 : index
    %c0_5 = arith.constant 0 : index
    %6 = vector.load %arg3[%c0_4, %c0_5] : memref<1x8xf32, #tpu.memory_space<vmem>>, vector<1x8xf32>
    %7 = vector.shape_cast %6 : vector<1x8xf32> to vector<1x1x8xf32>
    %8 = vector.broadcast %7 : vector<1x1x8xf32> to vector<1x256x8xf32>
    %9 = arith.addf %5, %8 : vector<1x256x8xf32>
    %cst = arith.constant 0.000000e+00 : f32
    %10 = vector.broadcast %cst : f32 to vector<1x256x8xf32>
    %11 = arith.maximumf %9, %10 : vector<1x256x8xf32>
    %c0_6 = arith.constant 0 : index
    %c0_7 = arith.constant 0 : index
    %c0_8 = arith.constant 0 : index
    %12 = vector.load %arg4[%c0_6, %c0_7, %c0_8] : memref<1x256x8xf32, #tpu.memory_space<vmem>>, vector<1x256x8xf32>
    tpu.vector_store %arg4[%c0_6, %c0_7, %c0_8], %11 {strides = array<i32>} : memref<1x256x8xf32, #tpu.memory_space<vmem>>, vector<1x256x8xf32>,
    return
  }
  func.func @transform_0(%arg0: i32) -> (i32, i32, i32) {
    %c0_i32 = arith.constant 0 : i32
    %c0_i32_0 = arith.constant 0 : i32
    %c0_i32_1 = arith.constant 0 : i32
    return %arg0, %c0_i32, %c0_i32_0 : i32, i32, i32
  }
  func.func @transform_1(%arg0: i32) -> (i32, i32) {
    %c0_i32 = arith.constant 0 : i32
    %c0_i32_0 = arith.constant 0 : i32
    %c0_i32_1 = arith.constant 0 : i32
    return %c0_i32, %c0_i32_0 : i32, i32
  }
  func.func @transform_2(%arg0: i32) -> (i32, i32) {
    %c0_i32 = arith.constant 0 : i32
    %c0_i32_0 = arith.constant 0 : i32
    %c0_i32_1 = arith.constant 0 : i32
    return %c0_i32, %c0_i32_0 : i32, i32
  }
  func.func @transform_3(%arg0: i32) -> (i32, i32, i32) {
    %c0_i32 = arith.constant 0 : i32
    %c0_i32_0 = arith.constant 0 : i32
    %c0_i32_1 = arith.constant 0 : i32
    return %arg0, %c0_i32, %c0_i32_0 : i32, i32, i32
  }
}

</mosaic_0001>

<bundles_post_ra>
// kernel: conv_bn_forward.3
= control target key start
LH: loop header
LB: loop body
LE: loop exit
PB: predicated region body
PF: predicated region fallthrough
CT: control target
= control target key end

     0   :  { %s557_s12 = smov 0   ;;  %s736_s0 = inlined_call_operand.vmem [shape: bf16[2,256,8], index: 0, kind: input, shape index: {}]   ;;  %s737_s1 = inlined_call_operand.vmem [shape: f32[1,8], index: 1, kind: input, shape index: {}]   ;;  %s738_s2 = inlined_call_operand.vmem [shape: f32[1,8], index: 2, kind: input, shape index: {}]   ;;  %s739_s3 = inlined_call_operand.vmem [shape: f32[2,256,8], index: 3, kind: output, shape index: {}]  }
   0x1 LB: > { %s427_s13 = sadd.s32 4294967295, %s535_s12   ;;  %p431_p0 = scmp.ge.s32.totalorder %s535_s12, 1  ;;  %s535_s12 = sphi %s557_s12, %s13_s12  }
   0x2   : > { %p137_p1 = scmp.lt.s32.totalorder %s535_s12, 3 }
   0x4   : > { %p138_p2 = pnand %p431_p0, %p137_p1 }
   0x5   : > { %p161_p3 = scmp.lt.s32.totalorder (!%p138_p2), %s427_s13, 1 }
   0x6   : > { %141 = sbr.rel (%p138_p2) target bundleno = 55 (0x37), region = 32 }
   0xb   : > { %s741_s13 = smov (!%p161_p3, %s427_s13), 1  ;;  %v576_v0 = vld [vmem:[%s737_s1] ss:$0 sm:$0xff]  ;;  %vm339_vm0 = vcmask 64512  }
   0xc   : > { %s438_s14 = sshll.u32 %s741_s13, 7  ;;  %v584_v5 = vld [vmem:[%s738_s2] ss:$0 sm:$0xff]  ;;  %s439_s22 = sshll.u32 %s741_s13, 8 }
   0xd   : > { %s571_s17 = scalar_lea.vmem %s736_s0, %s438_s14  ;;  %s603_s25 = scalar_lea.vmem %s739_s3, %s439_s22 }
   0xe   : > { %v441_v1 = vld [vmem:[%s571_s17] sm:$0xff]   ;;  %v504_v2 = vld [vmem:[%s571_s17 + $0x8] sm:$0xff]   ;;  %v505_v3 = vld [vmem:[%s571_s17 + $0x10] sm:$0xff]  }
   0xf   : > { %v442_v4 = vunpack.c.l.bf16 %v441_v1  ;;  %v443_v6 = vunpack.c.h.bf16 %v441_v1  ;;  %v446_v7 = vunpack.c.l.bf16 %v504_v2  ;;  %v447_v8 = vunpack.c.h.bf16 %v504_v2  ;;  %v506_v9 = vld [vmem:[%s571_s17 + $0x18] sm:$0xff]   ;;  %v507_v30 = vld [vmem:[%s571_s17 + $0x20] sm:$0xff]   ;;  %v508_v31 = vld [vmem:[%s571_s17 + $0x28] sm:$0xff]  }
  0x10   : > { %v450_v10 = vunpack.c.l.bf16 %v505_v3  ;;  %v451_v11 = vunpack.c.h.bf16 %v505_v3  ;;  %v454_v12 = vunpack.c.l.bf16 %v506_v9  ;;  %v455_v13 = vunpack.c.h.bf16 %v506_v9  ;;  %v509_v36 = vld [vmem:[%s571_s17 + $0x30] sm:$0xff]   ;;  %v510_v37 = vld [vmem:[%s571_s17 + $0x38] sm:$0xff]   ;;  %v511_v3 = vld [vmem:[%s571_s17 + $0x40] sm:$0xff]  }
  0x11   : > { %v239_v14 = vmul.f32 %v576_v0, %v442_v4  ;;  %v240_v15 = vmul.f32 %v576_v0, %v443_v6  ;;  %v241_v16 = vmul.f32 %v576_v0, %v446_v7  ;;  %v242_v17 = vmul.f32 %v576_v0, %v447_v8  ;;  %v512_v4 = vld [vmem:[%s571_s17 + $0x48] sm:$0xff]   ;;  %v513_v6 = vld [vmem:[%s571_s17 + $0x50] sm:$0xff]  }
  0x12   : > { %v243_v18 = vmul.f32 %v576_v0, %v450_v10  ;;  %v244_v19 = vmul.f32 %v576_v0, %v451_v11  ;;  %v245_v20 = vmul.f32 %v576_v0, %v454_v12  ;;  %v246_v21 = vmul.f32 %v576_v0, %v455_v13  ;;  %v514_v11 = vld [vmem:[%s571_s17 + $0x58] sm:$0xff]  }
  0x13   : > { %v275_v22 = vadd.f32 %v584_v5, %v239_v14  ;;  %v276_v23 = vadd.f32 %v584_v5, %v240_v15  ;;  %v277_v24 = vadd.f32 %v584_v5, %v241_v16  ;;  %v278_v25 = vadd.f32 %v584_v5, %v242_v17 }
  0x14   : > { %v279_v26 = vadd.f32 %v584_v5, %v243_v18  ;;  %v280_v27 = vadd.f32 %v584_v5, %v244_v19  ;;  %v281_v28 = vadd.f32 %v584_v5, %v245_v20  ;;  %v282_v29 = vadd.f32 %v584_v5, %v246_v21 }
  0x15   : > { %v307_v32 = vmax.f32 %v275_v22, 0.0  ;;  %v308_v33 = vmax.f32 %v276_v23, 0.0  ;;  %v309_v34 = vmax.f32 %v277_v24, 0.0  ;;  %v310_v35 = vmax.f32 %v278_v25, 0.0 }
  0x16   : > { %v311_v38 = vmax.f32 %v279_v26, 0.0  ;;  %v312_v39 = vmax.f32 %v280_v27, 0.0  ;;  %v313_v40 = vmax.f32 %v281_v28, 0.0  ;;  %v314_v41 = vmax.f32 %v282_v29, 0.0 }
  0x17   : > { %340 = vst.msk [vmem:[%s603_s25] sm:$0xff] %vm339_vm0, %v307_v32  ;;  %v458_v42 = vunpack.c.l.bf16 %v507_v30  ;;  %v459_v43 = vunpack.c.h.bf16 %v507_v30  ;;  %v462_v44 = vunpack.c.l.bf16 %v508_v31  ;;  %v463_v45 = vunpack.c.h.bf16 %v508_v31 }
  0x18   : > { %341 = vst.msk [vmem:[%s603_s25 + $0x8] sm:$0xff] %vm339_vm0, %v308_v33  ;;  %v466_v46 = vunpack.c.l.bf16 %v509_v36  ;;  %v467_v47 = vunpack.c.h.bf16 %v509_v36  ;;  %v470_v48 = vunpack.c.l.bf16 %v510_v37  ;;  %v471_v49 = vunpack.c.h.bf16 %v510_v37 }
  0x19   : > { %342 = vst.msk [vmem:[%s603_s25 + $0x10] sm:$0xff] %vm339_vm0, %v309_v34  ;;  %v247_v50 = vmul.f32 %v576_v0, %v458_v42  ;;  %v248_v51 = vmul.f32 %v576_v0, %v459_v43  ;;  %v249_v52 = vmul.f32 %v576_v0, %v462_v44  ;;  %v250_v53 = vmul.f32 %v576_v0, %v463_v45  ;;  %v517_v42 = vld [vmem:[%s571_s17 + $0x70] sm:$0xff]  }
  0x1a   : > { %343 = vst.msk [vmem:[%s603_s25 + $0x18] sm:$0xff] %vm339_vm0, %v310_v35  ;;  %v251_v54 = vmul.f32 %v576_v0, %v466_v46  ;;  %v252_v55 = vmul.f32 %v576_v0, %v467_v47  ;;  %v253_v56 = vmul.f32 %v576_v0, %v470_v48  ;;  %v254_v57 = vmul.f32 %v576_v0, %v471_v49  ;;  %v518_v47 = vld [vmem:[%s571_s17 + $0x78] sm:$0xff]  }
  0x1b   : > { %344 = vst.msk [vmem:[%s603_s25 + $0x20] sm:$0xff] %vm339_vm0, %v311_v38  ;;  %v283_v58 = vadd.f32 %v584_v5, %v247_v50  ;;  %v284_v59 = vadd.f32 %v584_v5, %v248_v51  ;;  %v285_v60 = vadd.f32 %v584_v5, %v249_v52  ;;  %v286_v61 = vadd.f32 %v584_v5, %v250_v53 }
  0x1c   : > { %345 = vst.msk [vmem:[%s603_s25 + $0x28] sm:$0xff] %vm339_vm0, %v312_v39  ;;  %v287_v62 = vadd.f32 %v584_v5, %v251_v54  ;;  %v288_v63 = vadd.f32 %v584_v5, %v252_v55  ;;  %v289_v1 = vadd.f32 %v584_v5, %v253_v56  ;;  %v290_v2 = vadd.f32 %v584_v5, %v254_v57 }
  0x1d   : > { %346 = vst.msk [vmem:[%s603_s25 + $0x30] sm:$0xff] %vm339_vm0, %v313_v40  ;;  %v315_v7 = vmax.f32 %v283_v58, 0.0  ;;  %v316_v8 = vmax.f32 %v284_v59, 0.0  ;;  %v317_v9 = vmax.f32 %v285_v60, 0.0  ;;  %v318_v10 = vmax.f32 %v286_v61, 0.0  ;;  %v515_v40 = vld [vmem:[%s571_s17 + $0x60] sm:$0xff]  }
  0x1e   : > { %347 = vst.msk [vmem:[%s603_s25 + $0x38] sm:$0xff] %vm339_vm0, %v314_v41  ;;  %v319_v12 = vmax.f32 %v287_v62, 0.0  ;;  %v320_v13 = vmax.f32 %v288_v63, 0.0  ;;  %v321_v14 = vmax.f32 %v289_v1, 0.0  ;;  %v322_v15 = vmax.f32 %v290_v2, 0.0  ;;  %v516_v41 = vld [vmem:[%s571_s17 + $0x68] sm:$0xff]  }
  0x1f   : > { %348 = vst.msk [vmem:[%s603_s25 + $0x40] sm:$0xff] %vm339_vm0, %v315_v7  ;;  %v474_v16 = vunpack.c.l.bf16 %v511_v3  ;;  %v475_v17 = vunpack.c.h.bf16 %v511_v3  ;;  %v478_v18 = vunpack.c.l.bf16 %v512_v4  ;;  %v479_v19 = vunpack.c.h.bf16 %v512_v4 }
  0x20   : > { %349 = vst.msk [vmem:[%s603_s25 + $0x48] sm:$0xff] %vm339_vm0, %v316_v8  ;;  %v482_v20 = vunpack.c.l.bf16 %v513_v6  ;;  %v483_v21 = vunpack.c.h.bf16 %v513_v6  ;;  %v486_v22 = vunpack.c.l.bf16 %v514_v11  ;;  %v487_v23 = vunpack.c.h.bf16 %v514_v11 }
  0x21   : > { %350 = vst.msk [vmem:[%s603_s25 + $0x50] sm:$0xff] %vm339_vm0, %v317_v9  ;;  %v255_v24 = vmul.f32 %v576_v0, %v474_v16  ;;  %v256_v25 = vmul.f32 %v576_v0, %v475_v17  ;;  %v257_v26 = vmul.f32 %v576_v0, %v478_v18  ;;  %v258_v27 = vmul.f32 %v576_v0, %v479_v19 }
  0x22   : > { %351 = vst.msk [vmem:[%s603_s25 + $0x58] sm:$0xff] %vm339_vm0, %v318_v10  ;;  %v259_v28 = vmul.f32 %v576_v0, %v482_v20  ;;  %v260_v29 = vmul.f32 %v576_v0, %v483_v21  ;;  %v261_v30 = vmul.f32 %v576_v0, %v486_v22  ;;  %v262_v31 = vmul.f32 %v576_v0, %v487_v23 }
  0x23   : > { %352 = vst.msk [vmem:[%s603_s25 + $0x60] sm:$0xff] %vm339_vm0, %v319_v12  ;;  %v291_v32 = vadd.f32 %v584_v5, %v255_v24  ;;  %v292_v33 = vadd.f32 %v584_v5, %v256_v25  ;;  %v293_v34 = vadd.f32 %v584_v5, %v257_v26  ;;  %v294_v35 = vadd.f32 %v584_v5, %v258_v27 }
  0x24   : > { %353 = vst.msk [vmem:[%s603_s25 + $0x68] sm:$0xff] %vm339_vm0, %v320_v13  ;;  %v295_v36 = vadd.f32 %v584_v5, %v259_v28  ;;  %v296_v37 = vadd.f32 %v584_v5, %v260_v29  ;;  %v297_v38 = vadd.f32 %v584_v5, %v261_v30  ;;  %v298_v39 = vadd.f32 %v584_v5, %v262_v31 }
  0x25   : > { %354 = vst.msk [vmem:[%s603_s25 + $0x70] sm:$0xff] %vm339_vm0, %v321_v14  ;;  %v323_v43 = vmax.f32 %v291_v32, 0.0  ;;  %v324_v44 = vmax.f32 %v292_v33, 0.0  ;;  %v325_v45 = vmax.f32 %v293_v34, 0.0  ;;  %v326_v46 = vmax.f32 %v294_v35, 0.0 }
  0x26   : > { %355 = vst.msk [vmem:[%s603_s25 + $0x78] sm:$0xff] %vm339_vm0, %v322_v15  ;;  %v327_v48 = vmax.f32 %v295_v36, 0.0  ;;  %v328_v49 = vmax.f32 %v296_v37, 0.0  ;;  %v329_v50 = vmax.f32 %v297_v38, 0.0  ;;  %v330_v51 = vmax.f32 %v298_v39, 0.0 }
  0x27   : > { %356 = vst.msk [vmem:[%s603_s25 + $0x80] sm:$0xff] %vm339_vm0, %v323_v43  ;;  %v490_v52 = vunpack.c.l.bf16 %v515_v40  ;;  %v491_v53 = vunpack.c.h.bf16 %v515_v40  ;;  %v494_v54 = vunpack.c.l.bf16 %v516_v41  ;;  %v495_v55 = vunpack.c.h.bf16 %v516_v41 }
  0x28   : > { %357 = vst.msk [vmem:[%s603_s25 + $0x88] sm:$0xff] %vm339_vm0, %v324_v44  ;;  %v498_v56 = vunpack.c.l.bf16 %v517_v42  ;;  %v499_v57 = vunpack.c.h.bf16 %v517_v42  ;;  %v502_v58 = vunpack.c.l.bf16 %v518_v47  ;;  %v503_v59 = vunpack.c.h.bf16 %v518_v47 }
  0x29   : > { %358 = vst.msk [vmem:[%s603_s25 + $0x90] sm:$0xff] %vm339_vm0, %v325_v45  ;;  %v263_v60 = vmul.f32 %v576_v0, %v490_v52  ;;  %v264_v61 = vmul.f32 %v576_v0, %v491_v53  ;;  %v265_v62 = vmul.f32 %v576_v0, %v494_v54  ;;  %v266_v63 = vmul.f32 %v576_v0, %v495_v55 }
  0x2a   : > { %359 = vst.msk [vmem:[%s603_s25 + $0x98] sm:$0xff] %vm339_vm0, %v326_v46  ;;  %v267_v1 = vmul.f32 %v576_v0, %v498_v56  ;;  %v268_v2 = vmul.f32 %v576_v0, %v499_v57  ;;  %v269_v3 = vmul.f32 %v576_v0, %v502_v58  ;;  %v270_v4 = vmul.f32 %v576_v0, %v503_v59 }
  0x2b   : > { %360 = vst.msk [vmem:[%s603_s25 + $0xa0] sm:$0xff] %vm339_vm0, %v327_v48  ;;  %v299_v6 = vadd.f32 %v584_v5, %v263_v60  ;;  %v300_v7 = vadd.f32 %v584_v5, %v264_v61  ;;  %v301_v8 = vadd.f32 %v584_v5, %v265_v62  ;;  %v302_v9 = vadd.f32 %v584_v5, %v266_v63 }
  0x2c   : > { %361 = vst.msk [vmem:[%s603_s25 + $0xa8] sm:$0xff] %vm339_vm0, %v328_v49  ;;  %v303_v10 = vadd.f32 %v584_v5, %v267_v1  ;;  %v304_v0 = vadd.f32 %v584_v5, %v268_v2  ;;  %v305_v14 = vadd.f32 %v584_v5, %v269_v3  ;;  %v306_v16 = vadd.f32 %v584_v5, %v270_v4 }
  0x2d   : > { %362 = vst.msk [vmem:[%s603_s25 + $0xb0] sm:$0xff] %vm339_vm0, %v329_v50  ;;  %v331_v11 = vmax.f32 %v299_v6, 0.0  ;;  %v332_v12 = vmax.f32 %v300_v7, 0.0  ;;  %v333_v13 = vmax.f32 %v301_v8, 0.0  ;;  %v334_v15 = vmax.f32 %v302_v9, 0.0 }
  0x2e   : > { %363 = vst.msk [vmem:[%s603_s25 + $0xb8] sm:$0xff] %vm339_vm0, %v330_v51  ;;  %v335_v17 = vmax.f32 %v303_v10, 0.0  ;;  %v336_v18 = vmax.f32 %v304_v0, 0.0  ;;  %v337_v19 = vmax.f32 %v305_v14, 0.0  ;;  %v338_v20 = vmax.f32 %v306_v16, 0.0 }
  0x2f   : > { %364 = vst.msk [vmem:[%s603_s25 + $0xc0] sm:$0xff] %vm339_vm0, %v331_v11 }
  0x30   : > { %365 = vst.msk [vmem:[%s603_s25 + $0xc8] sm:$0xff] %vm339_vm0, %v332_v12 }
  0x31   : > { %366 = vst.msk [vmem:[%s603_s25 + $0xd0] sm:$0xff] %vm339_vm0, %v333_v13 }
  0x32   : > { %367 = vst.msk [vmem:[%s603_s25 + $0xd8] sm:$0xff] %vm339_vm0, %v334_v15 }
  0x33   : > { %368 = vst.msk [vmem:[%s603_s25 + $0xe0] sm:$0xff] %vm339_vm0, %v335_v17 }
  0x34   : > { %369 = vst.msk [vmem:[%s603_s25 + $0xe8] sm:$0xff] %vm339_vm0, %v336_v18 }
  0x35   : > { %370 = vst.msk [vmem:[%s603_s25 + $0xf0] sm:$0xff] %vm339_vm0, %v337_v19 }
  0x36   : > { %371 = vst.msk [vmem:[%s603_s25 + $0xf8] sm:$0xff] %vm339_vm0, %v338_v20 }
  0x37 PF: > { %s13_s12 = sadd.s32 1, %s535_s12  }
  0x38   : > { %p10_p4 = scmp.ge.s32.totalorder %s13_s12, 4  }
  0x3a   :  { %12 = sbr.rel (!%p10_p4) target bundleno = 1 (0x1), region = 62 }

// kernel: conv_bn_forward.2
= control target key start
LH: loop header
LB: loop body
LE: loop exit
PB: predicated region body
PF: predicated region fallthrough
CT: control target
= control target key end

     0   :  { %s1458_s12 = smov 0   ;;  %s1873_s0 = inlined_call_operand.vmem [shape: bf16[2,288,12], index: 0, kind: input, shape index: {}]   ;;  %s1874_s1 = inlined_call_operand.vmem [shape: bf16[3,12,8], index: 1, kind: input, shape index: {}]   ;;  %s1875_s2 = inlined_call_operand.vmem [shape: bf16[2,256,8], index: 2, kind: output, shape index: {0}]   ;;  %s1876_s3 = inlined_call_operand.vmem [shape: f32[2,2,8], index: 3, kind: output, shape index: {1}]  }
   0x1 LB: > { %s1174_s13 = sadd.s32 4294967295, %s1436_s12   ;;  %p1178_p0 = scmp.ge.s32.totalorder %s1436_s12, 1  ;;  %s1436_s12 = sphi %s1458_s12, %s14_s12  }
   0x2   : > { %p140_p1 = scmp.lt.s32.totalorder %s1436_s12, 3 }
   0x4   : > { %p141_p2 = pnand %p1178_p0, %p140_p1 }
   0x5   : > { %p168_p3 = scmp.lt.s32.totalorder (!%p141_p2), %s1174_s13, 1 }
   0x6   : > { %144 = sbr.rel (%p141_p2) target bundleno = 373 (0x175), region = 28 }
   0xb   : > { %v1253_v0 = vld [vmem:[%s1874_s1 + $0x8] sm:$0xf]  ;;  %v1383_v1 = vld [vmem:[%s1874_s1 + $0x8] sm:$0x30]  ;;  %vm359_vm0 = vcmask 1045504   ;;  %s1878_s13 = smov (!%p168_p3, %s1174_s13), 1 }
   0xc   : > { %v1254_v2 = vor.u32 %v1383_v1, %v1253_v0  ;;  %v1277_v3 = vld [vmem:[%s1874_s1] sm:$0xf]  ;;  %v1382_v4 = vld [vmem:[%s1874_s1] sm:$0x30]  ;;  %v1361_v5 = vld [vmem:[%s1874_s1 + $0x10] sm:$0xf] }
   0xd   : > { %v1278_v6 = vor.u32 %v1382_v4, %v1277_v3  ;;  %v1384_v7 = vld [vmem:[%s1874_s1 + $0x10] sm:$0x30]  ;;  %s1421_s26 = smul.u32 144, %s1878_s13  ;;  %vm310_vm1 = vcmask 97280   ;;  %s1381_s30 = sshll.u32 %s1878_s13, 7  ;;  %vm878_vm2 = vcmask 60416  }
   0xe   : > { %v361_v8 = vsel %vm359_vm0, %v1254_v2, 0  ;;  %v1362_v9 = vor.u32 %v1384_v7, %v1361_v5  ;;  %s1565_s6 = scalar_lea.vmem %s1875_s2, %s1381_s30  ;;  %vm911_vm3 = vcmask 64512   ;;  %s1182_s7 = sshll.u32 %s1878_s13, 1  ;;  %vm1084_vm4 = vcmask 1040384  }
   0xf   : > { %370 = vmatpush.bf16.msra.mxu0 %v361_v8  ;;  %1418 = vmatpush.bf16.msra.mxu3 %v361_v8  ;;  %v466_v10 = vsel %vm359_vm0, %v1278_v6, 0  ;;  %s1493_s29 = scalar_lea.vmem %s1873_s0, %s1421_s26  ;;  %s181_s10 = scalar_lea.vmem %s1876_s3, %s1182_s7  ;;  %vm1086_vm5 = vcmask 58368  }
  0x10   : > { %475 = vmatpush.bf16.msra.mxu1 %v466_v10  ;;  %v723_v11 = vsel %vm359_vm0, %v1362_v9, 0  ;;  %v1386_v12 = vld [vmem:[%s1493_s29 + $0x8] sm:$0xff]  ;;  %v1385_v14 = vld [vmem:[%s1493_s29] sm:$0xff]  ;;  %v1402_v15 = vld [vmem:[%s1493_s29 + $0x10] sm:$0xff] }
  0x11   : > { %732 = vmatpush.bf16.msra.mxu2 %v723_v11  ;;  %v1398_v13 = vld [vmem:[%s1493_s29 + $0x68] sm:$0xff]  ;;  %v1387_v16 = vld [vmem:[%s1493_s29 + $0x10] sm:$0xff]  ;;  %v1403_v18 = vld [vmem:[%s1493_s29 + $0x18] sm:$0xff] }
  0x12   : > { %1255 = vmatmul.msk.bf16.vlgmr.msra.gmra.mxu0 %vm310_vm1, %v1386_v12  ;;  %1267 = vmatmul.msk.bf16.vlgmr.msra.gmra.mxu3 %vm310_vm1, %v1398_v13  ;;  %v1399_v17 = vld [vmem:[%s1493_s29 + $0x70] sm:$0xff]  ;;  %v1388_v19 = vld [vmem:[%s1493_s29 + $0x18] sm:$0xff]  ;;  %v1404_v21 = vld [vmem:[%s1493_s29 + $0x20] sm:$0xff] }
  0x13   : > { %1419 = vmatpush.bf16.msrb.mxu3 %v466_v10  ;;  %1279 = vmatmul.msk.bf16.vlgmr.msra.gmra.mxu1 %vm310_vm1, %v1385_v14  ;;  %v1400_v20 = vld [vmem:[%s1493_s29 + $0x78] sm:$0xff]  ;;  %v1389_v22 = vld [vmem:[%s1493_s29 + $0x20] sm:$0xff]  ;;  %v1405_v24 = vld [vmem:[%s1493_s29 + $0x28] sm:$0xff] }
  0x14   : > { %1363 = vmatmul.msk.bf16.vlgmr.msra.gmra.mxu2 %vm310_vm1, %v1402_v15  ;;  %v1401_v23 = vld [vmem:[%s1493_s29 + $0x80] sm:$0xff]  ;;  %v1390_v25 = vld [vmem:[%s1493_s29 + $0x28] sm:$0xff]  ;;  %v1406_v27 = vld [vmem:[%s1493_s29 + $0x30] sm:$0xff] }
  0x15   : > { %v1526_v26 = vld [vmem:[%s1493_s29 + $0x60] sm:$0xff]  ;;  %v1391_v28 = vld [vmem:[%s1493_s29 + $0x30] sm:$0xff]  ;;  %v1407_v29 = vld [vmem:[%s1493_s29 + $0x38] sm:$0xff] }
  0x16   : > { %v1392_v30 = vld [vmem:[%s1493_s29 + $0x38] sm:$0xff]  ;;  %v1408_v31 = vld [vmem:[%s1493_s29 + $0x40] sm:$0xff]  ;;  %v1409_v33 = vld [vmem:[%s1493_s29 + $0x48] sm:$0xff] }
  0x17   : > { %1420 = vmatpush.bf16.msra.mxu3 %v723_v11  ;;  %v1393_v32 = vld [vmem:[%s1493_s29 + $0x40] sm:$0xff]  ;;  %v1394_v34 = vld [vmem:[%s1493_s29 + $0x48] sm:$0xff]  ;;  %v1414_v35 = vld [vmem:[%s1493_s29 + $0x70] sm:$0xff] }
  0x18   : > { %v1410_v37 = vld [vmem:[%s1493_s29 + $0x50] sm:$0xff]  ;;  %v1415_v50 = vld [vmem:[%s1493_s29 + $0x78] sm:$0xff] }
  0x19   : > { %v1395_v49 = vld [vmem:[%s1493_s29 + $0x50] sm:$0xff]  ;;  %v1411_v54 = vld [vmem:[%s1493_s29 + $0x58] sm:$0xff] }
  0x1a   : > { %v1396_v15 = vld [vmem:[%s1493_s29 + $0x58] sm:$0xff] }
  0x22   : > { %1256 = vmatmul.msk.bf16.gmra.mxu0 %vm310_vm1, %v1387_v16  ;;  %1268 = vmatmul.msk.bf16.gmra.mxu3 %vm310_vm1, %v1399_v17 }
  0x23   : > { %1280 = vmatmul.msk.bf16.gmra.mxu1 %vm310_vm1, %v1386_v12 }
  0x24   : > { %1364 = vmatmul.msk.bf16.gmra.mxu2 %vm310_vm1, %v1403_v18 }
  0x32   : > { %1257 = vmatmul.msk.bf16.gmra.mxu0 %vm310_vm1, %v1388_v19  ;;  %1269 = vmatmul.msk.bf16.gmra.mxu3 %vm310_vm1, %v1400_v20 }
  0x33   : > { %1281 = vmatmul.msk.bf16.gmra.mxu1 %vm310_vm1, %v1387_v16  ;;  %v1416_v16 = vld [vmem:[%s1493_s29 + $0x80] sm:$0xff] }
  0x34   : > { %1365 = vmatmul.msk.bf16.gmra.mxu2 %vm310_vm1, %v1404_v21 }
  0x42   : > { %1258 = vmatmul.msk.bf16.gmra.mxu0 %vm310_vm1, %v1389_v22  ;;  %1270 = vmatmul.msk.bf16.gmra.mxu3 %vm310_vm1, %v1401_v23 }
  0x43   : > { %1282 = vmatmul.msk.bf16.gmra.mxu1 %vm310_vm1, %v1388_v19  ;;  %v1412_v19 = vld [vmem:[%s1493_s29 + $0x60] sm:$0xff] }
  0x44   : > { %1366 = vmatmul.msk.bf16.gmra.mxu2 %vm310_vm1, %v1405_v24 }
  0x52   : > { %1259 = vmatmul.msk.bf16.gmra.mxu0 %vm310_vm1, %v1390_v25  ;;  %1291 = vmatmul.msk.bf16.vlgmr.msrb.gmra.mxu3 %vm310_vm1, %v1526_v26 }
  0x53   : > { %1283 = vmatmul.msk.bf16.gmra.mxu1 %vm310_vm1, %v1389_v22 }
  0x54   : > { %1367 = vmatmul.msk.bf16.gmra.mxu2 %vm310_vm1, %v1406_v27 }
  0x62   : > { %1260 = vmatmul.msk.bf16.gmra.mxu0 %vm310_vm1, %v1391_v28  ;;  %1292 = vmatmul.msk.bf16.gmra.mxu3 %vm310_vm1, %v1398_v13 }
  0x63   : > { %1284 = vmatmul.msk.bf16.gmra.mxu1 %vm310_vm1, %v1390_v25 }
  0x64   : > { %1368 = vmatmul.msk.bf16.gmra.mxu2 %vm310_vm1, %v1407_v29 }
  0x72   : > { %1261 = vmatmul.msk.bf16.gmra.mxu0 %vm310_vm1, %v1392_v30  ;;  %1293 = vmatmul.msk.bf16.gmra.mxu3 %vm310_vm1, %v1399_v17 }
  0x73   : > { %1285 = vmatmul.msk.bf16.gmra.mxu1 %vm310_vm1, %v1391_v28 }
  0x74   : > { %1369 = vmatmul.msk.bf16.gmra.mxu2 %vm310_vm1, %v1408_v31 }
  0x82   : > { %1262 = vmatmul.msk.bf16.gmra.mxu0 %vm310_vm1, %v1393_v32  ;;  %1294 = vmatmul.msk.bf16.gmra.mxu3 %vm310_vm1, %v1400_v20 }
  0x83   : > { %1286 = vmatmul.msk.bf16.gmra.mxu1 %vm310_vm1, %v1392_v30 }
  0x84   : > { %1370 = vmatmul.msk.bf16.gmra.mxu2 %vm310_vm1, %v1409_v33 }
  0x8f   : > { %v372_v36 = vpop.f32.mrf.mxu0 }
  0x90   : > { %v477_v38 = vpop.f32.mrf.mxu1 }
  0x91   : > { %v478_v39 = vadd.f32 %v477_v38, %v372_v36 }
  0x92   : > { %1263 = vmatmul.msk.bf16.gmra.mxu0 %vm310_vm1, %v1394_v34  ;;  %1375 = vmatmul.msk.bf16.vlgmr.msra.gmra.mxu3 %vm310_vm1, %v1414_v35 }
  0x93   : > { %1287 = vmatmul.msk.bf16.gmra.mxu1 %vm310_vm1, %v1393_v32 }
  0x94   : > { %1371 = vmatmul.msk.bf16.gmra.mxu2 %vm310_vm1, %v1410_v37 }
  0x95   : > { %v1559_v40 = vpop.f32.mrf.mxu3 }
  0x97   : > { %v734_v41 = vpop.f32.mrf.mxu2  ;;  %v374_v43 = vpop.f32.mrf.mxu0 }
  0x98   : > { %v814_v42 = vadd.f32 %v734_v41, %v478_v39  ;;  %v479_v44 = vpop.f32.mrf.mxu1 }
  0x99   : > { %v480_v46 = vadd.f32 %v479_v44, %v374_v43  ;;  %v1417_v44 = vld [vmem:[%s1493_s29 + $0x88] sm:$0xff] }
  0x9a   : > { %v846_v45 = vpack.c.bf16 %v814_v42, %v814_v42  ;;  %v982_v51 = vmul.f32 %v814_v42, %v814_v42  ;;  %v912_v56 = vsel %vm911_vm3, %v814_v42, 0.0 }
  0x9c   : > { %879 = vst.msk [vmem:[%s1565_s6] sm:$0xf] %vm878_vm2, %v846_v45  ;;  %v1014_v61 = vsel %vm911_vm3, %v982_v51, 0.0 }
  0x9d   : > { %v1569_v47 = vpop.f32.mrf.mxu3 }
  0x9f   : > { %v736_v48 = vpop.f32.mrf.mxu2  ;;  %v377_v53 = vpop.f32.mrf.mxu0 }
  0xa0   : > { %v815_v52 = vadd.f32 %v736_v48, %v480_v46  ;;  %v482_v55 = vpop.f32.mrf.mxu1  ;;  %v1413_v48 = vld [vmem:[%s1493_s29 + $0x68] sm:$0xff] }
  0xa1   : > { %v483_v63 = vadd.f32 %v482_v55, %v377_v53 }
  0xa2   : > { %v847_v57 = vpack.c.bf16 %v815_v52, %v815_v52  ;;  %v913_v58 = vsel %vm911_vm3, %v815_v52, 0.0  ;;  %v983_v59 = vmul.f32 %v815_v52, %v815_v52  ;;  %1264 = vmatmul.msk.bf16.gmra.mxu0 %vm310_vm1, %v1395_v49  ;;  %1376 = vmatmul.msk.bf16.gmra.mxu3 %vm310_vm1, %v1415_v50 }
  0xa3   : > { %v914_v60 = vadd.f32 %v913_v58, %v912_v56  ;;  %1288 = vmatmul.msk.bf16.gmra.mxu1 %vm310_vm1, %v1394_v34 }
  0xa4   : > { %880 = vst.msk [vmem:[%s1565_s6 + $0x4] sm:$0xf] %vm878_vm2, %v847_v57  ;;  %v1015_v62 = vsel %vm911_vm3, %v983_v59, 0.0  ;;  %1372 = vmatmul.msk.bf16.gmra.mxu2 %vm310_vm1, %v1411_v54 }
  0xa5   : > { %v1016_v0 = vadd.f32 %v1015_v62, %v1014_v61  ;;  %v1584_v1 = vpop.f32.mrf.mxu3 }
  0xa7   : > { %v739_v2 = vpop.f32.mrf.mxu2  ;;  %v379_v4 = vpop.f32.mrf.mxu0 }
  0xa8   : > { %v816_v3 = vadd.f32 %v739_v2, %v483_v63  ;;  %v484_v5 = vpop.f32.mrf.mxu1 }
  0xa9   : > { %v485_v12 = vadd.f32 %v484_v5, %v379_v4 }
  0xaa   : > { %v848_v6 = vpack.c.bf16 %v816_v3, %v816_v3  ;;  %v915_v7 = vsel %vm911_vm3, %v816_v3, 0.0  ;;  %v984_v8 = vmul.f32 %v816_v3, %v816_v3 }
  0xab   : > { %v916_v9 = vadd.f32 %v915_v7, %v914_v60 }
  0xac   : > { %881 = vst.msk [vmem:[%s1565_s6 + $0x8] sm:$0xf] %vm878_vm2, %v848_v6  ;;  %v1017_v10 = vsel %vm911_vm3, %v984_v8, 0.0 }
  0xad   : > { %v1018_v11 = vadd.f32 %v1017_v10, %v1016_v0  ;;  %v1590_v13 = vpop.f32.mrf.mxu3 }
  0xaf   : > { %v741_v14 = vpop.f32.mrf.mxu2  ;;  %v382_v18 = vpop.f32.mrf.mxu0 }
  0xb0   : > { %v817_v17 = vadd.f32 %v741_v14, %v485_v12  ;;  %v487_v20 = vpop.f32.mrf.mxu1 }
  0xb1   : > { %v488_v27 = vadd.f32 %v487_v20, %v382_v18 }
  0xb2   : > { %v849_v21 = vpack.c.bf16 %v817_v17, %v817_v17  ;;  %v917_v22 = vsel %vm911_vm3, %v817_v17, 0.0  ;;  %v985_v23 = vmul.f32 %v817_v17, %v817_v17  ;;  %1265 = vmatmul.msk.bf16.gmra.mxu0 %vm310_vm1, %v1396_v15  ;;  %1377 = vmatmul.msk.bf16.gmra.mxu3 %vm310_vm1, %v1416_v16 }
  0xb3   : > { %v918_v24 = vadd.f32 %v917_v22, %v916_v9  ;;  %1289 = vmatmul.msk.bf16.gmra.mxu1 %vm310_vm1, %v1395_v49 }
  0xb4   : > { %882 = vst.msk [vmem:[%s1565_s6 + $0xc] sm:$0xf] %vm878_vm2, %v849_v21  ;;  %v1019_v25 = vsel %vm911_vm3, %v985_v23, 0.0  ;;  %1373 = vmatmul.msk.bf16.gmra.mxu2 %vm310_vm1, %v1412_v19 }
  0xb5   : > { %v1020_v28 = vadd.f32 %v1019_v25, %v1018_v11  ;;  %v1603_v29 = vpop.f32.mrf.mxu3 }
  0xb7   : > { %v744_v30 = vpop.f32.mrf.mxu2  ;;  %v384_v32 = vpop.f32.mrf.mxu0 }
  0xb8   : > { %v818_v31 = vadd.f32 %v744_v30, %v488_v27  ;;  %v489_v33 = vpop.f32.mrf.mxu1 }
  0xb9   : > { %v490_v41 = vadd.f32 %v489_v33, %v384_v32 }
  0xba   : > { %v850_v34 = vpack.c.bf16 %v818_v31, %v818_v31  ;;  %v919_v35 = vsel %vm911_vm3, %v818_v31, 0.0  ;;  %v986_v36 = vmul.f32 %v818_v31, %v818_v31 }
  0xbb   : > { %v920_v37 = vadd.f32 %v919_v35, %v918_v24 }
  0xbc   : > { %883 = vst.msk [vmem:[%s1565_s6 + $0x10] sm:$0xf] %vm878_vm2, %v850_v34  ;;  %v1021_v38 = vsel %vm911_vm3, %v986_v36, 0.0 }
  0xbd   : > { %v1022_v39 = vadd.f32 %v1021_v38, %v1020_v28  ;;  %v1609_v42 = vpop.f32.mrf.mxu3 }
  0xbf   : > { %v746_v43 = vpop.f32.mrf.mxu2  ;;  %v387_v46 = vpop.f32.mrf.mxu0 }
  0xc0   : > { %v819_v45 = vadd.f32 %v746_v43, %v490_v41  ;;  %v492_v49 = vpop.f32.mrf.mxu1 }
  0xc1   : > { %v493_v55 = vadd.f32 %v492_v49, %v387_v46 }
  0xc2   : > { %v851_v50 = vpack.c.bf16 %v819_v45, %v819_v45  ;;  %v921_v51 = vsel %vm911_vm3, %v819_v45, 0.0  ;;  %v987_v52 = vmul.f32 %v819_v45, %v819_v45  ;;  %1266 = vmatmul.msk.bf16.gmra.mxu0 %vm310_vm1, %v1526_v26  ;;  %1378 = vmatmul.msk.bf16.gmra.mxu3 %vm310_vm1, %v1417_v44 }
  0xc3   : > { %v922_v53 = vadd.f32 %v921_v51, %v920_v37  ;;  %1290 = vmatmul.msk.bf16.gmra.mxu1 %vm310_vm1, %v1396_v15 }
  0xc4   : > { %884 = vst.msk [vmem:[%s1565_s6 + $0x14] sm:$0xf] %vm878_vm2, %v851_v50  ;;  %v1023_v54 = vsel %vm911_vm3, %v987_v52, 0.0  ;;  %1374 = vmatmul.msk.bf16.gmra.mxu2 %vm310_vm1, %v1413_v48 }
  0xc5   : > { %v1024_v56 = vadd.f32 %v1023_v54, %v1022_v39  ;;  %v1622_v57 = vpop.f32.mrf.mxu3 }
  0xc7   : > { %v749_v58 = vpop.f32.mrf.mxu2  ;;  %v389_v60 = vpop.f32.mrf.mxu0 }
  0xc8   : > { %v820_v59 = vadd.f32 %v749_v58, %v493_v55  ;;  %v494_v61 = vpop.f32.mrf.mxu1 }
  0xc9   : > { %v495_v4 = vadd.f32 %v494_v61, %v389_v60 }
  0xca   : > { %v852_v26 = vpack.c.bf16 %v820_v59, %v820_v59  ;;  %v923_v62 = vsel %vm911_vm3, %v820_v59, 0.0  ;;  %v988_v63 = vmul.f32 %v820_v59, %v820_v59 }
  0xcb   : > { %v924_v0 = vadd.f32 %v923_v62, %v922_v53 }
  0xcc   : > { %885 = vst.msk [vmem:[%s1565_s6 + $0x18] sm:$0xf] %vm878_vm2, %v852_v26  ;;  %v1025_v2 = vsel %vm911_vm3, %v988_v63, 0.0 }
  0xcd   : > { %v1026_v3 = vadd.f32 %v1025_v2, %v1024_v56  ;;  %v1628_v5 = vpop.f32.mrf.mxu3 }
  0xcf   : > { %v751_v6 = vpop.f32.mrf.mxu2  ;;  %v392_v8 = vpop.f32.mrf.mxu0 }
  0xd0   : > { %v821_v7 = vadd.f32 %v751_v6, %v495_v4  ;;  %v497_v9 = vpop.f32.mrf.mxu1 }
  0xd1   : > { %v498_v16 = vadd.f32 %v497_v9, %v392_v8 }
  0xd2   : > { %v853_v10 = vpack.c.bf16 %v821_v7, %v821_v7  ;;  %v925_v11 = vsel %vm911_vm3, %v821_v7, 0.0  ;;  %v989_v12 = vmul.f32 %v821_v7, %v821_v7 }
  0xd3   : > { %v926_v14 = vadd.f32 %v925_v11, %v924_v0 }
  0xd4   : > { %886 = vst.msk [vmem:[%s1565_s6 + $0x1c] sm:$0xf] %vm878_vm2, %v853_v10  ;;  %v1027_v15 = vsel %vm911_vm3, %v989_v12, 0.0 }
  0xd5   : > { %v1028_v17 = vadd.f32 %v1027_v15, %v1026_v3  ;;  %v1634_v18 = vpop.f32.mrf.mxu3 }
  0xd7   : > { %v754_v19 = vpop.f32.mrf.mxu2  ;;  %v394_v21 = vpop.f32.mrf.mxu0 }
  0xd8   : > { %v822_v20 = vadd.f32 %v754_v19, %v498_v16  ;;  %v499_v22 = vpop.f32.mrf.mxu1 }
  0xd9   : > { %v500_v31 = vadd.f32 %v499_v22, %v394_v21 }
  0xda   : > { %v854_v23 = vpack.c.bf16 %v822_v20, %v822_v20  ;;  %v927_v24 = vsel %vm911_vm3, %v822_v20, 0.0  ;;  %v990_v25 = vmul.f32 %v822_v20, %v822_v20 }
  0xdb   : > { %v928_v27 = vadd.f32 %v927_v24, %v926_v14 }
  0xdc   : > { %887 = vst.msk [vmem:[%s1565_s6 + $0x20] sm:$0xf] %vm878_vm2, %v854_v23  ;;  %v1029_v28 = vsel %vm911_vm3, %v990_v25, 0.0 }
  0xdd   : > { %v1030_v30 = vadd.f32 %v1029_v28, %v1028_v17  ;;  %v1640_v32 = vpop.f32.mrf.mxu3 }
  0xdf   : > { %v756_v33 = vpop.f32.mrf.mxu2  ;;  %v397_v35 = vpop.f32.mrf.mxu0 }
  0xe0   : > { %v823_v34 = vadd.f32 %v756_v33, %v500_v31  ;;  %v502_v36 = vpop.f32.mrf.mxu1 }
  0xe1   : > { %v503_v44 = vadd.f32 %v502_v36, %v397_v35 }
  0xe2   : > { %v855_v37 = vpack.c.bf16 %v823_v34, %v823_v34  ;;  %v929_v38 = vsel %vm911_vm3, %v823_v34, 0.0  ;;  %v991_v39 = vmul.f32 %v823_v34, %v823_v34 }
  0xe3   : > { %v930_v41 = vadd.f32 %v929_v38, %v928_v27 }
  0xe4   : > { %888 = vst.msk [vmem:[%s1565_s6 + $0x24] sm:$0xf] %vm878_vm2, %v855_v37  ;;  %v1031_v43 = vsel %vm911_vm3, %v991_v39, 0.0 }
  0xe5   : > { %v1032_v45 = vadd.f32 %v1031_v43, %v1030_v30  ;;  %v1646_v46 = vpop.f32.mrf.mxu3 }
  0xe7   : > { %v759_v48 = vpop.f32.mrf.mxu2  ;;  %v399_v50 = vpop.f32.mrf.mxu0 }
  0xe8   : > { %v824_v49 = vadd.f32 %v759_v48, %v503_v44  ;;  %v504_v51 = vpop.f32.mrf.mxu1 }
  0xe9   : > { %v505_v59 = vadd.f32 %v504_v51, %v399_v50  ;;  %v538_v51 = vadd.f32 %v1634_v18, %v1559_v40  ;;  %v540_v40 = vadd.f32 %v1640_v32, %v1569_v47  ;;  %v543_v32 = vadd.f32 %v1646_v46, %v1584_v1 }
  0xea   : > { %v856_v52 = vpack.c.bf16 %v824_v49, %v824_v49  ;;  %v931_v53 = vsel %vm911_vm3, %v824_v49, 0.0  ;;  %v992_v54 = vmul.f32 %v824_v49, %v824_v49 }
  0xeb   : > { %v932_v55 = vadd.f32 %v931_v53, %v930_v41 }
  0xec   : > { %889 = vst.msk [vmem:[%s1565_s6 + $0x28] sm:$0xf] %vm878_vm2, %v856_v52  ;;  %v1033_v56 = vsel %vm911_vm3, %v992_v54, 0.0 }
  0xed   : > { %v1034_v58 = vadd.f32 %v1033_v56, %v1032_v45  ;;  %v1652_v60 = vpop.f32.mrf.mxu3 }
  0xee   : > { %v545_v1 = vadd.f32 %v1652_v60, %v1590_v13 }
  0xef   : > { %v761_v61 = vpop.f32.mrf.mxu2  ;;  %v402_v62 = vpop.f32.mrf.mxu0 }
  0xf0   : > { %v825_v26 = vadd.f32 %v761_v61, %v505_v59  ;;  %v507_v63 = vpop.f32.mrf.mxu1 }
  0xf1   : > { %v508_v7 = vadd.f32 %v507_v63, %v402_v62 }
  0xf2   : > { %v857_v0 = vpack.c.bf16 %v825_v26, %v825_v26  ;;  %v933_v2 = vsel %vm911_vm3, %v825_v26, 0.0  ;;  %v993_v3 = vmul.f32 %v825_v26, %v825_v26 }
  0xf3   : > { %v934_v4 = vadd.f32 %v933_v2, %v932_v55 }
  0xf4   : > { %890 = vst.msk [vmem:[%s1565_s6 + $0x2c] sm:$0xf] %vm878_vm2, %v857_v0  ;;  %v1035_v6 = vsel %vm911_vm3, %v993_v3, 0.0 }
  0xf5   : > { %v1036_v8 = vadd.f32 %v1035_v6, %v1034_v58  ;;  %v1658_v9 = vpop.f32.mrf.mxu3 }
  0xf6   : > { %v548_v60 = vadd.f32 %v1658_v9, %v1603_v29 }
  0xf7   : > { %v764_v10 = vpop.f32.mrf.mxu2  ;;  %v404_v12 = vpop.f32.mrf.mxu0 }
  0xf8   : > { %v826_v11 = vadd.f32 %v764_v10, %v508_v7  ;;  %v509_v14 = vpop.f32.mrf.mxu1 }
  0xf9   : > { %v510_v22 = vadd.f32 %v509_v14, %v404_v12 }
  0xfa   : > { %v858_v15 = vpack.c.bf16 %v826_v11, %v826_v11  ;;  %v935_v16 = vsel %vm911_vm3, %v826_v11, 0.0  ;;  %v994_v17 = vmul.f32 %v826_v11, %v826_v11 }
  0xfb   : > { %v1661_v19 = vadd.f32 %v935_v16, %v934_v4 }
  0xfc   : > { %891 = vst.msk [vmem:[%s1565_s6 + $0x30] sm:$0xf] %vm878_vm2, %v858_v15  ;;  %v1037_v20 = vsel %vm911_vm3, %v994_v17, 0.0 }
  0xfd   : > { %v1666_v21 = vadd.f32 %v1037_v20, %v1036_v8  ;;  %v1668_v23 = vpop.f32.mrf.mxu3 }
  0xfe   : > { %v550_v9 = vadd.f32 %v1668_v23, %v1609_v42 }
  0xff   : > { %v766_v24 = vpop.f32.mrf.mxu2  ;;  %v407_v27 = vpop.f32.mrf.mxu0 }
 0x100   : > { %v1670_v25 = vadd.f32 %v766_v24, %v510_v22  ;;  %v512_v28 = vpop.f32.mrf.mxu1 }
 0x101   : > { %v513_v31 = vadd.f32 %v512_v28, %v407_v27 }
 0x102   : > { %v859_v30 = vpack.c.bf16 %v1670_v25, %v1670_v25 }
 0x104   : > { %892 = vst.msk [vmem:[%s1565_s6 + $0x34] sm:$0xf] %vm878_vm2, %v859_v30 }
 0x105   : > { %v1676_v33 = vpop.f32.mrf.mxu3 }
 0x107   : > { %v769_v34 = vpop.f32.mrf.mxu2  ;;  %v409_v36 = vpop.f32.mrf.mxu0 }
 0x108   : > { %v1678_v35 = vadd.f32 %v769_v34, %v513_v31  ;;  %v514_v37 = vpop.f32.mrf.mxu1 }
 0x109   : > { %v515_v39 = vadd.f32 %v514_v37, %v409_v36 }
 0x10a   : > { %v860_v38 = vpack.c.bf16 %v1678_v35, %v1678_v35  ;;  %v996_v29 = vmul.f32 %v1678_v35, %v1678_v35 }
 0x10c   : > { %893 = vst.msk [vmem:[%s1565_s6 + $0x38] sm:$0xf] %vm878_vm2, %v860_v38 }
 0x10d   : > { %v1684_v41 = vpop.f32.mrf.mxu3 }
 0x10f   : > { %v771_v43 = vpop.f32.mrf.mxu2  ;;  %v412_v45 = vpop.f32.mrf.mxu0 }
 0x110   : > { %v1686_v44 = vadd.f32 %v771_v43, %v515_v39  ;;  %v517_v48 = vpop.f32.mrf.mxu1 }
 0x111   : > { %v518_v50 = vadd.f32 %v517_v48, %v412_v45  ;;  %v995_v48 = vmul.f32 %v1670_v25, %v1670_v25 }
 0x112   : > { %v861_v49 = vpack.c.bf16 %v1686_v44, %v1686_v44  ;;  %v941_v42 = vsel %vm911_vm3, %v1686_v44, 0.0 }
 0x114   : > { %894 = vst.msk [vmem:[%s1565_s6 + $0x3c] sm:$0xf] %vm878_vm2, %v861_v49 }
 0x115   : > { %v794_v52 = vpop.f32.mrf.mxu3 }
 0x116   : > { %v1694_v54 = vadd.f32 %v794_v52, %v538_v51  ;;  %v1039_v51 = vsel %vm911_vm3, %v995_v48, 0.0  ;;  %v939_v52 = vsel %vm911_vm3, %v1678_v35, 0.0 }
 0x117   : > { %v774_v53 = vpop.f32.mrf.mxu2  ;;  %v414_v56 = vpop.f32.mrf.mxu0 }
 0x118   : > { %v1696_v55 = vadd.f32 %v774_v53, %v518_v50  ;;  %v870_v58 = vpack.c.bf16 %v1694_v54, %v1694_v54  ;;  %v519_v59 = vpop.f32.mrf.mxu1  ;;  %v937_v50 = vsel %vm911_vm3, %v1670_v25, 0.0  ;;  %v997_v53 = vmul.f32 %v1686_v44, %v1686_v44 }
 0x119   : > { %v520_v18 = vadd.f32 %v519_v59, %v414_v56  ;;  %v938_v25 = vadd.f32 %v937_v50, %v1661_v19 }
 0x11a   : > { %v862_v61 = vpack.c.bf16 %v1696_v55, %v1696_v55  ;;  %903 = vst.msk [vmem:[%s1565_s6 + $0x60] sm:$0xf] %vm878_vm2, %v870_v58  ;;  %v998_v23 = vmul.f32 %v1696_v55, %v1696_v55 }
 0x11c   : > { %895 = vst.msk [vmem:[%s1565_s6 + $0x40] sm:$0xf] %vm878_vm2, %v862_v61 }
 0x11d   : > { %v796_v26 = vpop.f32.mrf.mxu3 }
 0x11e   : > { %v1708_v63 = vadd.f32 %v796_v26, %v540_v40  ;;  %v1041_v40 = vsel %vm911_vm3, %v996_v29, 0.0  ;;  %v940_v26 = vadd.f32 %v939_v52, %v938_v25 }
 0x11f   : > { %v776_v62 = vpop.f32.mrf.mxu2  ;;  %v417_v2 = vpop.f32.mrf.mxu0 }
 0x120   : > { %v1710_v0 = vadd.f32 %v776_v62, %v520_v18  ;;  %v871_v3 = vpack.c.bf16 %v1708_v63, %v1708_v63  ;;  %v522_v4 = vpop.f32.mrf.mxu1  ;;  %v1040_v18 = vadd.f32 %v1039_v51, %v1666_v21  ;;  %v1045_v21 = vsel %vm911_vm3, %v998_v23, 0.0 }
 0x121   : > { %v523_v47 = vadd.f32 %v522_v4, %v417_v2  ;;  %v943_v4 = vsel %vm911_vm3, %v1696_v55, 0.0  ;;  %v553_v55 = vadd.f32 %v1676_v33, %v1622_v57  ;;  %v555_v51 = vadd.f32 %v1684_v41, %v1628_v5 }
 0x122   : > { %v863_v6 = vpack.c.bf16 %v1710_v0, %v1710_v0  ;;  %904 = vst.msk [vmem:[%s1565_s6 + $0x64] sm:$0xf] %vm878_vm2, %v871_v3  ;;  %v1043_v3 = vsel %vm911_vm3, %v997_v53, 0.0  ;;  %v999_v44 = vmul.f32 %v1710_v0, %v1710_v0  ;;  %v1006_v41 = vmul.f32 %v1694_v54, %v1694_v54 }
 0x124   : > { %896 = vst.msk [vmem:[%s1565_s6 + $0x44] sm:$0xf] %vm878_vm2, %v863_v6 }
 0x125   : > { %v799_v7 = vpop.f32.mrf.mxu3 }
 0x126   : > { %v1722_v10 = vadd.f32 %v799_v7, %v543_v32  ;;  %v942_v32 = vadd.f32 %v941_v42, %v940_v26  ;;  %v945_v7 = vsel %vm911_vm3, %v1710_v0, 0.0 }
 0x127   : > { %v779_v8 = vpop.f32.mrf.mxu2  ;;  %v419_v12 = vpop.f32.mrf.mxu0 }
 0x128   : > { %v1724_v11 = vadd.f32 %v779_v8, %v523_v47  ;;  %v872_v14 = vpack.c.bf16 %v1722_v10, %v1722_v10  ;;  %v524_v15 = vpop.f32.mrf.mxu1  ;;  %v1042_v47 = vadd.f32 %v1041_v40, %v1040_v18 }
 0x129   : > { %v525_v46 = vadd.f32 %v524_v15, %v419_v12  ;;  %v944_v15 = vadd.f32 %v943_v4, %v942_v32 }
 0x12a   : > { %v864_v16 = vpack.c.bf16 %v1724_v11, %v1724_v11  ;;  %905 = vst.msk [vmem:[%s1565_s6 + $0x68] sm:$0xf] %vm878_vm2, %v872_v14  ;;  %v1000_v8 = vmul.f32 %v1724_v11, %v1724_v11  ;;  %v1044_v14 = vadd.f32 %v1043_v3, %v1042_v47  ;;  %v1007_v47 = vmul.f32 %v1708_v63, %v1708_v63 }
 0x12c   : > { %897 = vst.msk [vmem:[%s1565_s6 + $0x48] sm:$0xf] %vm878_vm2, %v864_v16  ;;  %v1047_v16 = vsel %vm911_vm3, %v999_v44, 0.0 }
 0x12d   : > { %v801_v17 = vpop.f32.mrf.mxu3 }
 0x12e   : > { %v1736_v22 = vadd.f32 %v801_v17, %v545_v1  ;;  %v947_v1 = vsel %vm911_vm3, %v1724_v11, 0.0  ;;  %v1046_v17 = vadd.f32 %v1045_v21, %v1044_v14 }
 0x12f   : > { %v781_v20 = vpop.f32.mrf.mxu2  ;;  %v422_v27 = vpop.f32.mrf.mxu0 }
 0x130   : > { %v1738_v24 = vadd.f32 %v781_v20, %v525_v46  ;;  %v873_v28 = vpack.c.bf16 %v1736_v22, %v1736_v22  ;;  %v527_v30 = vpop.f32.mrf.mxu1  ;;  %v946_v20 = vadd.f32 %v945_v7, %v944_v15 }
 0x131   : > { %v528_v13 = vadd.f32 %v527_v30, %v422_v27  ;;  %v1049_v30 = vsel %vm911_vm3, %v1000_v8, 0.0  ;;  %v1061_v8 = vsel %vm911_vm3, %v1006_v41, 0.0 }
 0x132   : > { %v865_v31 = vpack.c.bf16 %v1738_v24, %v1738_v24  ;;  %906 = vst.msk [vmem:[%s1565_s6 + $0x6c] sm:$0xf] %vm878_vm2, %v873_v28  ;;  %v1001_v46 = vmul.f32 %v1738_v24, %v1738_v24  ;;  %v949_v57 = vsel %vm911_vm3, %v1738_v24, 0.0  ;;  %v948_v11 = vadd.f32 %v947_v1, %v946_v20 }
 0x133   : > { %v1009_v1 = vmul.f32 %v1736_v22, %v1736_v22 }
 0x134   : > { %898 = vst.msk [vmem:[%s1565_s6 + $0x4c] sm:$0xf] %vm878_vm2, %v865_v31  ;;  %v950_v48 = vadd.f32 %v949_v57, %v948_v11 }
 0x135   : > { %v804_v34 = vpop.f32.mrf.mxu3  ;;  %v1067_v57 = vsel %vm911_vm3, %v1009_v1, 0.0 }
 0x136   : > { %v1750_v37 = vadd.f32 %v804_v34, %v548_v60  ;;  %v1051_v34 = vsel %vm911_vm3, %v1001_v46, 0.0 }
 0x137   : > { %v784_v36 = vpop.f32.mrf.mxu2  ;;  %v424_v39 = vpop.f32.mrf.mxu0 }
 0x138   : > { %v834_v38 = vadd.f32 %v784_v36, %v528_v13  ;;  %v874_v43 = vpack.c.bf16 %v1750_v37, %v1750_v37  ;;  %v529_v45 = vpop.f32.mrf.mxu1  ;;  %v1048_v13 = vadd.f32 %v1047_v16, %v1046_v17  ;;  %v963_v16 = vsel %vm911_vm3, %v1722_v10, 0.0 }
 0x139   : > { %v530_v56 = vadd.f32 %v529_v45, %v424_v39  ;;  %v1010_v20 = vmul.f32 %v1750_v37, %v1750_v37 }
 0x13a   : > { %v866_v49 = vpack.c.bf16 %v834_v38, %v834_v38  ;;  %907 = vst.msk [vmem:[%s1565_s6 + $0x70] sm:$0xf] %vm878_vm2, %v874_v43  ;;  %v1002_v33 = vmul.f32 %v834_v38, %v834_v38  ;;  %v951_v36 = vsel %vm911_vm3, %v834_v38, 0.0  ;;  %v1050_v45 = vadd.f32 %v1049_v30, %v1048_v13 }
 0x13b   : > { %v952_v38 = vadd.f32 %v951_v36, %v950_v48  ;;  %v1069_v11 = vsel %vm911_vm3, %v1010_v20, 0.0 }
 0x13c   : > { %899 = vst.msk [vmem:[%s1565_s6 + $0x50] sm:$0xf] %vm878_vm2, %v866_v49  ;;  %v1053_v50 = vsel %vm911_vm3, %v1002_v33, 0.0  ;;  %v1052_v52 = vadd.f32 %v1051_v34, %v1050_v45 }
 0x13d   : > { %v806_v58 = vpop.f32.mrf.mxu3 }
 0x13e   : > { %v1772_v61 = vadd.f32 %v806_v58, %v550_v9 }
 0x13f   : > { %v786_v59 = vpop.f32.mrf.mxu2  ;;  %v427_v62 = vpop.f32.mrf.mxu0 }
 0x140   : > { %v835_v35 = vadd.f32 %v786_v59, %v530_v56  ;;  %v875_v19 = vpack.c.bf16 %v1772_v61, %v1772_v61  ;;  %v532_v2 = vpop.f32.mrf.mxu1  ;;  %v1054_v59 = vadd.f32 %v1053_v50, %v1052_v52  ;;  %v1011_v33 = vmul.f32 %v1772_v61, %v1772_v61 }
 0x141   : > { %v533_v12 = vadd.f32 %v532_v2, %v427_v62 }
 0x142   : > { %v867_v6 = vpack.c.bf16 %v835_v35, %v835_v35  ;;  %908 = vst.msk [vmem:[%s1565_s6 + $0x74] sm:$0xf] %vm878_vm2, %v875_v19  ;;  %v1003_v39 = vmul.f32 %v835_v35, %v835_v35  ;;  %v953_v29 = vsel %vm911_vm3, %v835_v35, 0.0 }
 0x143   : > { %v954_v40 = vadd.f32 %v953_v29, %v952_v38 }
 0x144   : > { %900 = vst.msk [vmem:[%s1565_s6 + $0x54] sm:$0xf] %vm878_vm2, %v867_v6  ;;  %v1055_v53 = vsel %vm911_vm3, %v1003_v39, 0.0  ;;  %v959_v6 = vsel %vm911_vm3, %v1694_v54, 0.0  ;;  %v1063_v54 = vsel %vm911_vm3, %v1007_v47, 0.0  ;;  %v1071_v39 = vsel %vm911_vm3, %v1011_v33, 0.0 }
 0x145   : > { %v809_v0 = vpop.f32.mrf.mxu3  ;;  %v1056_v26 = vadd.f32 %v1055_v53, %v1054_v59 }
 0x146   : > { %v1803_v28 = vadd.f32 %v809_v0, %v553_v55  ;;  %v1008_v55 = vmul.f32 %v1722_v10, %v1722_v10  ;;  %v967_v10 = vsel %vm911_vm3, %v1750_v37, 0.0 }
 0x147   : > { %v789_v27 = vpop.f32.mrf.mxu2  ;;  %v429_v49 = vpop.f32.mrf.mxu0 }
 0x148   : > { %v836_v31 = vadd.f32 %v789_v27, %v533_v12  ;;  %v876_v60 = vpack.c.bf16 %v1803_v28, %v1803_v28  ;;  %v534_v24 = vpop.f32.mrf.mxu1  ;;  %v961_v12 = vsel %vm911_vm3, %v1708_v63, 0.0  ;;  %v1065_v17 = vsel %vm911_vm3, %v1008_v55, 0.0 }
 0x149   : > { %v535_v58 = vadd.f32 %v534_v24, %v429_v49  ;;  %v965_v63 = vsel %vm911_vm3, %v1736_v22, 0.0  ;;  %v969_v22 = vsel %vm911_vm3, %v1772_v61, 0.0  ;;  %v971_v37 = vsel %vm911_vm3, %v1803_v28, 0.0 }
 0x14a   : > { %v868_v43 = vpack.c.bf16 %v836_v31, %v836_v31  ;;  %909 = vst.msk [vmem:[%s1565_s6 + $0x78] sm:$0xf] %vm878_vm2, %v876_v60  ;;  %v1004_v9 = vmul.f32 %v836_v31, %v836_v31  ;;  %v955_v56 = vsel %vm911_vm3, %v836_v31, 0.0  ;;  %v1012_v60 = vmul.f32 %v1803_v28, %v1803_v28 }
 0x14b   : > { %v956_v19 = vadd.f32 %v955_v56, %v954_v40 }
 0x14c   : > { %901 = vst.msk [vmem:[%s1565_s6 + $0x58] sm:$0xf] %vm878_vm2, %v868_v43  ;;  %v1057_v35 = vsel %vm911_vm3, %v1004_v9, 0.0  ;;  %v1073_v49 = vsel %vm911_vm3, %v1012_v60, 0.0 }
 0x14d   : > { %v811_v25 = vpop.f32.mrf.mxu3  ;;  %v1058_v4 = vadd.f32 %v1057_v35, %v1056_v26 }
 0x14e   : > { %v845_v23 = vadd.f32 %v811_v25, %v555_v51 }
 0x14f   : > { %v791_v42 = vpop.f32.mrf.mxu2 }
 0x150   : > { %v837_v18 = vadd.f32 %v791_v42, %v535_v58  ;;  %v877_v5 = vpack.c.bf16 %v845_v23, %v845_v23  ;;  %v1013_v43 = vmul.f32 %v845_v23, %v845_v23  ;;  %v973_v24 = vsel %vm911_vm3, %v845_v23, 0.0 }
 0x152   : > { %v869_v62 = vpack.c.bf16 %v837_v18, %v837_v18  ;;  %v957_v2 = vsel %vm911_vm3, %v837_v18, 0.0  ;;  %v1005_v3 = vmul.f32 %v837_v18, %v837_v18  ;;  %910 = vst.msk [vmem:[%s1565_s6 + $0x7c] sm:$0xf] %vm878_vm2, %v877_v5  ;;  %v1075_v29 = vsel %vm911_vm3, %v1013_v43, 0.0 }
 0x153   : > { %v958_v44 = vadd.f32 %v957_v2, %v956_v19 }
 0x154   : > { %902 = vst.msk [vmem:[%s1565_s6 + $0x5c] sm:$0xf] %vm878_vm2, %v869_v62  ;;  %v1059_v32 = vsel %vm911_vm3, %v1005_v3, 0.0 }
 0x155   : > { %v960_v21 = vadd.f32 %v959_v6, %v958_v44  ;;  %v1060_v7 = vadd.f32 %v1059_v32, %v1058_v4 }
 0x157   : > { %v962_v14 = vadd.f32 %v961_v12, %v960_v21  ;;  %v1062_v15 = vadd.f32 %v1061_v8, %v1060_v7 }
 0x159   : > { %v964_v46 = vadd.f32 %v963_v16, %v962_v14  ;;  %v1064_v0 = vadd.f32 %v1063_v54, %v1062_v15 }
 0x15b   : > { %v1066_v27 = vadd.f32 %v1065_v17, %v1064_v0  ;;  %v966_v30 = vadd.f32 %v965_v63, %v964_v46 }
 0x15d   : > { %v968_v31 = vadd.f32 %v967_v10, %v966_v30  ;;  %v1068_v13 = vadd.f32 %v1067_v57, %v1066_v27 }
 0x15f   : > { %v970_v34 = vadd.f32 %v969_v22, %v968_v31  ;;  %v1070_v36 = vadd.f32 %v1069_v11, %v1068_v13 }
 0x161   : > { %v972_v45 = vadd.f32 %v971_v37, %v970_v34  ;;  %v1072_v48 = vadd.f32 %v1071_v39, %v1070_v36 }
 0x163   : > { %v974_v50 = vadd.f32 %v973_v24, %v972_v45  ;;  %v1074_v61 = vadd.f32 %v1073_v49, %v1072_v48 }
 0x165   : > { %v975_v9 = vrot.slane %v974_v50, 4  ;;  %v1076_v51 = vadd.f32 %v1075_v29, %v1074_v61 }
 0x167   : > { %v976_v52 = vadd.f32 %v975_v9, %v974_v50  ;;  %v1077_v38 = vrot.slane %v1076_v51, 4 }
 0x169   : > { %v977_v53 = vrot.slane %v976_v52, 2  ;;  %v1078_v56 = vadd.f32 %v1077_v38, %v1076_v51 }
 0x16b   : > { %v978_v58 = vadd.f32 %v977_v53, %v976_v52  ;;  %v1079_v28 = vrot.slane %v1078_v56, 2 }
 0x16d   : > { %v979_v25 = vrot.slane %v978_v58, 1  ;;  %v1080_v59 = vadd.f32 %v1079_v28, %v1078_v56 }
 0x16f   : > { %v1081_v40 = vrot.slane %v1080_v59, 1  ;;  %v980_v42 = vadd.f32 %v979_v25, %v978_v58 }
 0x171   : > { %v1082_v23 = vadd.f32 %v1081_v40, %v1080_v59 }
 0x173   : > { %v1085_v35 = vsel %vm1084_vm4, %v980_v42, %v1082_v23 }
 0x174   : > { %1087 = vst.msk [vmem:[%s181_s10] sm:$0x3] %vm1086_vm5, %v1085_v35 }
 0x175 PF: > { %s14_s12 = sadd.s32 1, %s1436_s12  }
 0x176   : > { %p11_p4 = scmp.ge.s32.totalorder %s14_s12, 4  }
 0x178   :  { %13 = sbr.rel (!%p11_p4) target bundleno = 1 (0x1), region = 72 }

</bundles_post_ra>
